<compile_context>
chip_gen: v5e
topology: v5e:2x2
jax: 0.10.0
libtpu: 0.0.40
codegen_flags: <defaults>
</compile_context>

<pallas_src>
from functools import partial

import jax
import jax.numpy as jnp
from jax import lax
from jax.experimental import pallas as pl
from jax.experimental.pallas import tpu as pltpu


def _round_up(x, m):
    return (x + m - 1) // m * m


def _fused_kimcnn_kernel(tok_ref, table_ref, w_ref, b_ref, out_ref, *,
                         kernel_sizes, n_filters, seq_len, vocab, rows):
    # tok_ref  : (R*S, 1)   int32 token ids for R batch rows
    # table_ref: (V, E)     bf16 embedding table
    # w_ref    : (E, Cpad)  bf16 concatenated per-tap conv weights (all heads)
    # b_ref    : (1, OutW)  f32  concatenated biases (padded to OutW lanes)
    # out_ref  : (R, OutW)  f32  pooled features (padded to OutW lanes)
    R, S, V, F_ = rows, seq_len, vocab, n_filters
    RS = R * S

    # ---- embedding gather as a one-hot MXU matmul (no (B,S,E) HBM tensor) ----
    tok = tok_ref[...]                                              # (RS, 1) int32
    lane_ids = lax.broadcasted_iota(jnp.int32, (RS, V), 1)
    onehot = jnp.where(tok == lane_ids, 1.0, 0.0).astype(jnp.bfloat16)   # (RS, V)
    emb = jnp.dot(onehot, table_ref[...],
                  preferred_element_type=jnp.float32)               # (RS, E), exact bf16 rows
    emb = emb.astype(jnp.bfloat16)                                  # lossless cast

    # ---- all conv taps of all heads in ONE aligned MXU pass ----
    y = jnp.dot(emb, w_ref[...], preferred_element_type=jnp.float32)    # (RS, Cpad)
    # Sublane-split is tile-aligned for S % 8 == 0 (demo S=16) -> effectively free.
    y = y.reshape(R, S, y.shape[-1])                                # (R, S, Cpad)

    # ---- per head: accumulate shifted taps over time, max over the valid window ----
    pooled = []
    off = 0
    for K in kernel_sizes:
        T = S - K + 1                                               # per-head valid-conv length
        acc = y[:, 0:T, off:off + F_]
        for k in range(1, K):
            acc = acc + y[:, k:k + T, off + k * F_: off + (k + 1) * F_]
        pooled.append(jnp.max(acc, axis=1))                         # (R, F)
        off += K * F_

    cat = jnp.concatenate(pooled, axis=1)                           # (R, n_heads*F)
    pad = out_ref.shape[1] - cat.shape[1]
    if pad > 0:
        cat = jnp.concatenate([cat, jnp.zeros((R, pad), jnp.float32)], axis=1)
    # max_t(relu(x + b)) == relu(max_t(x) + b): bias + ReLU only on (R, OutW).
    out_ref[...] = jnp.maximum(cat + b_ref[...], 0.0)


def kim_cnn_pallas(tokens, emb_table, convs, *, kernel_sizes, n_filters,
                   rows_per_block=128):
    """tokens: (B, S) int; emb_table: (V, E) f32; convs: [(w (F,1,K,E), b (F,))] -> (B, nH*F) f32."""
    tokens = jnp.asarray(tokens, jnp.int32)
    B, S = tokens.shape
    V, E = emb_table.shape
    n_heads = len(kernel_sizes)
    F_ = n_filters

    # ---- batch-row blocking (amortizes the ~0.35us/step fixed cost; feeds both TCs) ----
    n_blocks = max(1, -(-B // rows_per_block))
    R = -(-B // n_blocks)
    if n_blocks > 1:
        R = _round_up(R, 8)                    # keep row blocks sublane-aligned
    B_pad = R * n_blocks
    if B_pad != B:
        tokens = jnp.pad(tokens, ((0, B_pad - B), (0, 0)))   # padded rows sliced off below
    tok_col = tokens.reshape(B_pad * S, 1)

    # ---- concatenated per-tap conv weights: columns [off_h + k*F, off_h+(k+1)*F) = W_h[:,0,k,:]^T ----
    C = sum(kernel_sizes) * F_
    C_pad = _round_up(C, 128)
    w_cols = []
    for (w, _b), K in zip(convs, kernel_sizes):
        for k in range(K):
            w_cols.append(jnp.transpose(w[:, 0, k, :]))      # (E, F)
    w_cat = jnp.concatenate(w_cols, axis=1)                  # (E, C)
    if C_pad != C:
        w_cat = jnp.pad(w_cat, ((0, 0), (0, C_pad - C)))
    w_cat = w_cat.astype(jnp.bfloat16)
    table_bf16 = emb_table.astype(jnp.bfloat16)

    # ---- concatenated biases, padded to the lane-dense output width ----
    out_w = _round_up(n_heads * F_, 128)
    b_cat = jnp.concatenate([b for (_w, b) in convs]).reshape(1, n_heads * F_)
    b_cat = jnp.pad(b_cat, ((0, 0), (0, out_w - n_heads * F_))).astype(jnp.float32)

    kernel = partial(_fused_kimcnn_kernel, kernel_sizes=tuple(kernel_sizes),
                     n_filters=F_, seq_len=S, vocab=V, rows=R)
    out = pl.pallas_call(
        kernel,
        out_shape=jax.ShapeDtypeStruct((B_pad, out_w), jnp.float32),
        grid_spec=pltpu.PrefetchScalarGridSpec(
            num_scalar_prefetch=0,
            grid=(B_pad // R,),
            in_specs=[
                pl.BlockSpec((R * S, 1), lambda i: (i, 0)),    # token ids for this row block
                pl.BlockSpec((V, E), lambda i: (0, 0)),        # embedding table (bf16)
                pl.BlockSpec((E, C_pad), lambda i: (0, 0)),    # all conv taps (bf16)
                pl.BlockSpec((1, out_w), lambda i: (0, 0)),    # biases
            ],
            out_specs=pl.BlockSpec((R, out_w), lambda i: (i, 0)),
        ),
        compiler_params=pltpu.CompilerParams(dimension_semantics=("parallel",)),
    )(tok_col, table_bf16, w_cat, b_cat)
    return out[:B, :n_heads * F_]


def init_params(key, input_size, embedding_dim, n_filters, kernel_sizes):
    keys = jax.random.split(key, 1 + 2 * len(kernel_sizes))
    emb_w = jax.random.normal(keys[0], (input_size, embedding_dim), jnp.float32)
    convs = []
    for i, K in enumerate(kernel_sizes):
        # PyTorch Conv2d weight shape: (n_filters, 1, K, embedding_dim)
        w = 0.1 * jax.random.normal(keys[1 + 2 * i], (n_filters, 1, K, embedding_dim),
                                    jnp.float32)
        b = 0.1 * jax.random.normal(keys[2 + 2 * i], (n_filters,), jnp.float32)
        convs.append((w, b))
    return emb_w, convs


def kim_cnn_forward(params, x):
    """x is a tuple/list; x[0] are int token ids of shape (B, S) (as in the PyTorch forward)."""
    emb_w, convs = params
    tokens = x[0]
    kernel_sizes = tuple(w.shape[2] for (w, _b) in convs)
    n_filters = convs[0][0].shape[0]
    # nn.Dropout is treated in eval mode (identity).
    # TODO(synk): training-mode dropout masking omitted.
    return kim_cnn_pallas(tokens, emb_w, convs,
                          kernel_sizes=kernel_sizes, n_filters=n_filters)


def _reference_forward(params, x):
    # Pure-JAX reference of the same math (bf16-rounded operands, f32 accumulation).
    emb_w, convs = params
    tokens = x[0]
    table = emb_w.astype(jnp.bfloat16).astype(jnp.float32)
    embedded = jnp.take(table, tokens, axis=0)        # (B, S, E)
    B, S, E = embedded.shape
    pooled = []
    for (w, b) in convs:
        K = w.shape[2]
        wb = w.astype(jnp.bfloat16).astype(jnp.float32)
        T = S - K + 1
        windows = jnp.stack([embedded[:, k:k + T, :] for k in range(K)], axis=2)  # (B,T,K,E)
        conv = jnp.einsum('btke,fke->btf', windows, wb[:, 0, :, :]) + b           # (B,T,F)
        conv = jnp.maximum(conv, 0.0)
        pooled.append(jnp.max(conv, axis=1))                                      # (B,F)
    return jnp.concatenate(pooled, axis=1)


if __name__ == "__main__":
    key = jax.random.PRNGKey(0)
    k_param, k_tok = jax.random.split(key)

    input_size = 32        # vocab size
    embedding_dim = 128
    n_filters = 8
    kernel_sizes = (3, 4, 5)
    batch, seq_len = 2, 16

    params = init_params(k_param, input_size, embedding_dim, n_filters, kernel_sizes)
    tokens = jax.random.randint(k_tok, (batch, seq_len), 0, input_size, dtype=jnp.int32)
    x = (tokens,)          # forward expects x[0]

    out = kim_cnn_forward(params, x)
    out = jax.block_until_ready(out)

    ref = _reference_forward(params, x)
    assert out.shape == (batch, len(kernel_sizes) * n_filters)
    assert jnp.allclose(out, ref, atol=1e-2, rtol=1e-2), float(jnp.max(jnp.abs(out - ref)))

    print("KERNEL_OK")
</pallas_src>

<mosaic_0001>
module attributes {stable_mosaic.version = 11 : i64} {
  func.func @_fused_kimcnn_kernel(%arg0: i32, %arg1: memref<32x1xi32, #tpu.memory_space<vmem>>, %arg2: memref<32x128xbf16, #tpu.memory_space<vmem>>, %arg3: memref<128x128xbf16, #tpu.memory_space<vmem>>, %arg4: memref<1x128xf32, #tpu.memory_space<vmem>>, %arg5: memref<2x128xf32, #tpu.memory_space<vmem>>) attributes {dimension_semantics = [#tpu.dimension_semantics<parallel>], iteration_bounds = array<i64: 1>, scalar_prefetch = 0 : i64, scratch_operands = 0 : i64, tpu.core_type = #tpu.core_type<tc>, window_params = [{transform_indices = @transform_0, window_bounds = array<i64: 32, 1>}, {pipeline_mode = #tpu.pipeline_mode<synchronous>, transform_indices = @transform_1, window_bounds = array<i64: 32, 128>}, {pipeline_mode = #tpu.pipeline_mode<synchronous>, transform_indices = @transform_2, window_bounds = array<i64: 128, 128>}, {pipeline_mode = #tpu.pipeline_mode<synchronous>, transform_indices = @transform_3, window_bounds = array<i64: 1, 128>}, {transform_indices = @transform_4, window_bounds = array<i64: 2, 128>}]} {
    %c0 = arith.constant 0 : index
    %c0_0 = arith.constant 0 : index
    %0 = vector.load %arg1[%c0, %c0_0] : memref<32x1xi32, #tpu.memory_space<vmem>>, vector<32x1xi32>
    %1 = tpu.iota {dimensions = array<i32: 1>} : vector<32x32xi32>
    %2 = vector.broadcast %0 : vector<32x1xi32> to vector<32x32xi32>
    %3 = arith.cmpi eq, %2, %1 : vector<32x32xi32>
    %cst = arith.constant 1.000000e+00 : f32
    %cst_1 = arith.constant 0.000000e+00 : f32
    %4 = vector.broadcast %cst : f32 to vector<32x32xf32>
    %5 = vector.broadcast %cst_1 : f32 to vector<32x32xf32>
    %6 = arith.select %3, %4, %5 : vector<32x32xi1>, vector<32x32xf32>
    %7 = arith.truncf %6 : vector<32x32xf32> to vector<32x32xbf16>
    %c0_2 = arith.constant 0 : index
    %c0_3 = arith.constant 0 : index
    %8 = vector.load %arg2[%c0_2, %c0_3] : memref<32x128xbf16, #tpu.memory_space<vmem>>, vector<32x128xbf16>
    %cst_4 = arith.constant dense<0.000000e+00> : vector<32x128xf32>
    %9 = tpu.matmul %7, %8, %cst_4 {dimension_numbers = #tpu.dot_dimension_numbers<[1], [0], [0], [1], [0, 0, 1, 1], [], []>} : vector<32x32xbf16>, vector<32x128xbf16>, vector<32x128xf32> -> vector<32x128xf32>
    %10 = arith.truncf %9 : vector<32x128xf32> to vector<32x128xbf16>
    %c0_5 = arith.constant 0 : index
    %c0_6 = arith.constant 0 : index
    %11 = vector.load %arg3[%c0_5, %c0_6] : memref<128x128xbf16, #tpu.memory_space<vmem>>, vector<128x128xbf16>
    %cst_7 = arith.constant dense<0.000000e+00> : vector<32x128xf32>
    %12 = tpu.matmul %10, %11, %cst_7 {dimension_numbers = #tpu.dot_dimension_numbers<[1], [0], [0], [1], [0, 0, 1, 1], [], []>} : vector<32x128xbf16>, vector<128x128xbf16>, vector<32x128xf32> -> vector<32x128xf32>
    %13 = vector.shape_cast %12 : vector<32x128xf32> to vector<2x16x128xf32>
    %14 = vector.extract_strided_slice %13 {offsets = [0, 0, 0], sizes = [2, 14, 8], strides = [1, 1, 1]} : vector<2x16x128xf32> to vector<2x14x8xf32>
    %15 = vector.extract_strided_slice %13 {offsets = [0, 1, 8], sizes = [2, 14, 8], strides = [1, 1, 1]} : vector<2x16x128xf32> to vector<2x14x8xf32>
    %16 = arith.addf %14, %15 : vector<2x14x8xf32>
    %17 = vector.extract_strided_slice %13 {offsets = [0, 2, 16], sizes = [2, 14, 8], strides = [1, 1, 1]} : vector<2x16x128xf32> to vector<2x14x8xf32>
    %18 = arith.addf %16, %17 : vector<2x14x8xf32>
    %cst_8 = arith.constant dense<0xFF800000> : vector<2x8xf32>
    %19 = vector.multi_reduction <maximumf>, %18, %cst_8 [1] : vector<2x14x8xf32> to vector<2x8xf32>
    %20 = vector.extract_strided_slice %13 {offsets = [0, 0, 24], sizes = [2, 13, 8], strides = [1, 1, 1]} : vector<2x16x128xf32> to vector<2x13x8xf32>
    %21 = vector.extract_strided_slice %13 {offsets = [0, 1, 32], sizes = [2, 13, 8], strides = [1, 1, 1]} : vector<2x16x128xf32> to vector<2x13x8xf32>
    %22 = arith.addf %20, %21 : vector<2x13x8xf32>
    %23 = vector.extract_strided_slice %13 {offsets = [0, 2, 40], sizes = [2, 13, 8], strides = [1, 1, 1]} : vector<2x16x128xf32> to vector<2x13x8xf32>
    %24 = arith.addf %22, %23 : vector<2x13x8xf32>
    %25 = vector.extract_strided_slice %13 {offsets = [0, 3, 48], sizes = [2, 13, 8], strides = [1, 1, 1]} : vector<2x16x128xf32> to vector<2x13x8xf32>
    %26 = arith.addf %24, %25 : vector<2x13x8xf32>
    %cst_9 = arith.constant dense<0xFF800000> : vector<2x8xf32>
    %27 = vector.multi_reduction <maximumf>, %26, %cst_9 [1] : vector<2x13x8xf32> to vector<2x8xf32>
    %28 = vector.extract_strided_slice %13 {offsets = [0, 0, 56], sizes = [2, 12, 8], strides = [1, 1, 1]} : vector<2x16x128xf32> to vector<2x12x8xf32>
    %29 = vector.extract_strided_slice %13 {offsets = [0, 1, 64], sizes = [2, 12, 8], strides = [1, 1, 1]} : vector<2x16x128xf32> to vector<2x12x8xf32>
    %30 = arith.addf %28, %29 : vector<2x12x8xf32>
    %31 = vector.extract_strided_slice %13 {offsets = [0, 2, 72], sizes = [2, 12, 8], strides = [1, 1, 1]} : vector<2x16x128xf32> to vector<2x12x8xf32>
    %32 = arith.addf %30, %31 : vector<2x12x8xf32>
    %33 = vector.extract_strided_slice %13 {offsets = [0, 3, 80], sizes = [2, 12, 8], strides = [1, 1, 1]} : vector<2x16x128xf32> to vector<2x12x8xf32>
    %34 = arith.addf %32, %33 : vector<2x12x8xf32>
    %35 = vector.extract_strided_slice %13 {offsets = [0, 4, 88], sizes = [2, 12, 8], strides = [1, 1, 1]} : vector<2x16x128xf32> to vector<2x12x8xf32>
    %36 = arith.addf %34, %35 : vector<2x12x8xf32>
    %cst_10 = arith.constant dense<0xFF800000> : vector<2x8xf32>
    %37 = vector.multi_reduction <maximumf>, %36, %cst_10 [1] : vector<2x12x8xf32> to vector<2x8xf32>
    %38 = tpu.concatenate %19, %27, %37 in 1 : vector<2x8xf32>, vector<2x8xf32>, vector<2x8xf32> -> vector<2x24xf32>
    %cst_11 = arith.constant 0.000000e+00 : f32
    %39 = vector.broadcast %cst_11 : f32 to vector<2x104xf32>
    %40 = tpu.concatenate %38, %39 in 1 : vector<2x24xf32>, vector<2x104xf32> -> vector<2x128xf32>
    %c0_12 = arith.constant 0 : index
    %c0_13 = arith.constant 0 : index
    %41 = vector.load %arg4[%c0_12, %c0_13] : memref<1x128xf32, #tpu.memory_space<vmem>>, vector<1x128xf32>
    %42 = vector.broadcast %41 : vector<1x128xf32> to vector<2x128xf32>
    %43 = arith.addf %40, %42 : vector<2x128xf32>
    %cst_14 = arith.constant 0.000000e+00 : f32
    %44 = vector.broadcast %cst_14 : f32 to vector<2x128xf32>
    %45 = arith.maximumf %43, %44 : vector<2x128xf32>
    %c0_15 = arith.constant 0 : index
    %c0_16 = arith.constant 0 : index
    %46 = vector.load %arg5[%c0_15, %c0_16] : memref<2x128xf32, #tpu.memory_space<vmem>>, vector<2x128xf32>
    tpu.vector_store %arg5[%c0_15, %c0_16], %45 {strides = array<i32>} : memref<2x128xf32, #tpu.memory_space<vmem>>, vector<2x128xf32>,
    return
  }
  func.func @transform_0(%arg0: i32) -> (i32, i32) {
    %c0_i32 = arith.constant 0 : i32
    %c0_i32_0 = arith.constant 0 : i32
    return %arg0, %c0_i32 : i32, i32
  }
  func.func @transform_1(%arg0: i32) -> (i32, i32) {
    %c0_i32 = arith.constant 0 : i32
    %c0_i32_0 = arith.constant 0 : i32
    %c0_i32_1 = arith.constant 0 : i32
    return %c0_i32, %c0_i32_0 : i32, i32
  }
  func.func @transform_2(%arg0: i32) -> (i32, i32) {
    %c0_i32 = arith.constant 0 : i32
    %c0_i32_0 = arith.constant 0 : i32
    %c0_i32_1 = arith.constant 0 : i32
    return %c0_i32, %c0_i32_0 : i32, i32
  }
  func.func @transform_3(%arg0: i32) -> (i32, i32) {
    %c0_i32 = arith.constant 0 : i32
    %c0_i32_0 = arith.constant 0 : i32
    %c0_i32_1 = arith.constant 0 : i32
    return %c0_i32, %c0_i32_0 : i32, i32
  }
  func.func @transform_4(%arg0: i32) -> (i32, i32) {
    %c0_i32 = arith.constant 0 : i32
    %c0_i32_0 = arith.constant 0 : i32
    return %arg0, %c0_i32 : i32, i32
  }
}

</mosaic_0001>

<bundles_post_ra>
// kernel: tpu_custom_call.1
= control target key start
LH: loop header
LB: loop body
LE: loop exit
PB: predicated region body
PF: predicated region fallthrough
CT: control target
= control target key end

     0   :  { %9 = vsyncpa [#allocation3], 0  ;;  %s624_s0 = inlined_call_operand.vmem [shape: s32[32,1], index: 0, kind: input, shape index: {}]   ;;  %s625_s1 = inlined_call_operand.vmem [shape: bf16[32,128], index: 1, kind: input, shape index: {}]   ;;  %s626_s2 = inlined_call_operand.hbm [shape: bf16[128,128], index: 2, kind: input, shape index: {}]   ;;  %s627_s3 = inlined_call_operand.vmem [shape: f32[1,128], index: 3, kind: input, shape index: {}]   ;;  %s628_s4 = inlined_call_operand.hbm [shape: f32[2,128], index: 4, kind: output, shape index: {}]  }
   0x1   :  { %10 = vsyncpa [#allocation4], 0  ;;  %s19_s17 = sshll.u32 %s626_s2, 4  ;;  %s518_s18 = smov [#allocation2]   ;;  %s20_s17 = int_to_ptr.hbm [resolvable:$true] %s19_s17 }
   0x2   :  { %s21_s19 = sshll.u32 %s518_s18, 4  ;;  %s519_s20 = smov 64   ;;  %s22_s19 = int_to_ptr.vmem [resolvable:$true] %s21_s19 }
   0x3   :  { %s520_s21 = smov 4  }
   0x4   :  { %27 = dma.hbm_to_vmem [thread:$0]  %s20_s17, 1024, %s22_s19, [#allocation3], %s519_s20, %s519_s20, %s520_s21  }
   0x5   :  { %514 = dma.done.wait [#allocation3], 1024  }
   0x6   :  { %515 = vsyncadd [#allocation3], 4294966272  ;;  %v521_v0 = vmov 0   ;;  %v35_v1 = vld [vmem:[%s624_s0] sm:$0xff]  ;;  %v37_v2 = vld [vmem:[%s624_s0 + $0x10] sm:$0xff]  ;;  %v39_v8 = vlaneseq  ;;  %v522_v16 = vmov 0.0  }
   0x7   :  { %463 = vset.pattern.permute.xlu0 %v521_v0  ;;  %464 = vset.pattern.permute.xlu1 %v521_v0  ;;  %v36_v3 = vld [vmem:[%s624_s0 + $0x8] sm:$0xff]  ;;  %v38_v4 = vld [vmem:[%s624_s0 + $0x18] sm:$0xff]  ;;  %v434_v6 = vld [vmem:[%s625_s1] sm:$0xff]  ;;  %vm79_vm2 = vcmask 261120   ;;  %s523_s0 = smov 104   ;;  %s525_s7 = smov 120  }
   0x8   :  { %42 = vperm.xlu0 %463, %v35_v1   ;;  %48 = vperm.xlu1 %464, %v37_v2   ;;  %v435_v5 = vld [vmem:[%s625_s1 + $0x8] sm:$0xff]  ;;  %v443_v7 = vld [vmem:[#allocation2 + $0x38] sm:$0xff]  ;;  %v442_v9 = vld [vmem:[#allocation2 + $0x30] sm:$0xff]  ;;  %v40_v11 = vand.u32 127, %v39_v8  ;;  %s524_s1 = smov 112   ;;  %vm303_vm5 = vcmask 1043456  }
   0x9   :  { %92 = vmatpush.bf16.msra.mxu0 %v435_v5  ;;  %171 = vmatpush.bf16.msra.mxu1 %v443_v7  ;;  %v441_v12 = vld [vmem:[#allocation2 + $0x28] sm:$0xff]  ;;  %v440_v13 = vld [vmem:[#allocation2 + $0x20] sm:$0xff]  ;;  %v439_v20 = vld [vmem:[#allocation2 + $0x18] sm:$0xff]  ;;  %vm260_vm6 = vcmask 1044480   ;;  %vm194_vm7 = vcmask 1046528   ;;  %s526_s8 = smov 96  }
   0xa   :  { %444 = vmatpush.bf16.msra.mxu2 %v443_v7  ;;  %v438_v25 = vld [vmem:[#allocation2 + $0x10] sm:$0xff]  ;;  %v437_v26 = vld [vmem:[#allocation2 + $0x8] sm:$0xff]  ;;  %v436_v27 = vld [vmem:[#allocation2] sm:$0xff]  ;;  %vm217_vm8 = vcmask 1045504   ;;  %vm240_vm9 = vcmask 64512   ;;  %vm242_vm10 = vcmask 62464  }
   0xb   :  { %vm283_vm11 = vcmask 261312   ;;  %vm285_vm12 = vcmask 258240   ;;  %vm328_vm13 = vcmask 519616   ;;  %vm326_vm14 = vcmask 523712   ;;  %s527_s9 = smov 88   ;;  %s528_s12 = smov [#allocation5]  }
   0xc   :  { %vm348_vm15 = vcmask 1041409   ;;  %s380_s13 = sshll.u32 %s528_s12, 4  ;;  %s382_s16 = sshll.u32 %s628_s4, 4  ;;  %s381_s13 = int_to_ptr.vmem [resolvable:$true] %s380_s13  ;;  %s383_s16 = int_to_ptr.hbm [resolvable:$true] %s382_s16 }
   0xd   :  { %93 = vmatpush.bf16.msra.mxu0 %v434_v6  ;;  %172 = vmatpush.bf16.msra.mxu1 %v442_v9 }
   0xe   :  { %445 = vmatpush.bf16.msra.mxu2 %v442_v9 }
  0x10   :  { %45 = vperm.xlu0 %463, %v36_v3   ;;  %51 = vperm.xlu1 %464, %v38_v4  }
  0x11   :  { %173 = vmatpush.bf16.msra.mxu1 %v441_v12 }
  0x12   :  { %446 = vmatpush.bf16.msra.mxu2 %v441_v12 }
  0x15   :  { %174 = vmatpush.bf16.msra.mxu1 %v440_v13 }
  0x16   :  { %447 = vmatpush.bf16.msra.mxu2 %v440_v13 }
  0x19   :  { %175 = vmatpush.bf16.msra.mxu1 %v439_v20 }
  0x1a   :  { %448 = vmatpush.bf16.msra.mxu2 %v439_v20 }
  0x1d   :  { %176 = vmatpush.bf16.msra.mxu1 %v438_v25 }
  0x1e   :  { %449 = vmatpush.bf16.msra.mxu2 %v438_v25 }
  0x21   :  { %177 = vmatpush.bf16.msra.mxu1 %v437_v26 }
  0x22   :  { %450 = vmatpush.bf16.msra.mxu2 %v437_v26 }
  0x25   :  { %178 = vmatpush.bf16.msra.mxu1 %v436_v27 }
  0x26   :  { %451 = vmatpush.bf16.msra.mxu2 %v436_v27 }
  0x7a   :  { %v43_v10 = vpop.permute.xlu0 %42  ;;  %v49_v14 = vpop.permute.xlu1 %48 }
  0x7b   :  { %vm53_vm0 = vcmp.eq.s32.totalorder %v43_v10, %v40_v11  ;;  %vm55_vm3 = vcmp.eq.s32.totalorder %v49_v14, %v40_v11 }
  0x7c   :  { %v57_v17 = vsel %vm53_vm0, 1.0, %v522_v16  ;;  %v59_v22 = vsel %vm55_vm3, 1.0, %v522_v16  ;;  %vm364_vm0 = vcmask 130048  }
  0x82   :  { %v46_v15 = vpop.permute.xlu0 %45  ;;  %v52_v21 = vpop.permute.xlu1 %51 }
  0x83   :  { %vm54_vm1 = vcmp.eq.s32.totalorder %v46_v15, %v40_v11  ;;  %vm56_vm4 = vcmp.eq.s32.totalorder %v52_v21, %v40_v11 }
  0x84   :  { %v58_v18 = vsel %vm54_vm1, 1.0, %v522_v16  ;;  %v60_v23 = vsel %vm56_vm4, 1.0, %v522_v16  ;;  %vm366_vm1 = vcmask 195584  }
  0x85   :  { %v61_v19 = vpack.c.bf16 %v58_v18, %v57_v17  ;;  %v62_v24 = vpack.c.bf16 %v60_v23, %v59_v22 }
  0x87   :  { %400 = vmatmul.msk.bf16.vlgmr.msra.gmra.mxu0 %vm79_vm2, %v61_v19 }
  0x97   :  { %401 = vmatmul.msk.bf16.gmra.mxu0 %vm79_vm2, %v62_v24 }
 0x104   :  { %v95_v28 = vpop.f32.mrf.mxu0 }
 0x10c   :  { %v97_v29 = vpop.f32.mrf.mxu0 }
 0x10d   :  { %v105_v30 = vpack.c.bf16 %v97_v29, %v95_v28 }
 0x10f   :  { %179 = vmatmul.bf16.vlgmr.msra.gmra.mxu1 %v105_v30 }
 0x114   :  { %v100_v31 = vpop.f32.mrf.mxu0 }
 0x11c   :  { %v102_v32 = vpop.f32.mrf.mxu0 }
 0x11d   :  { %v106_v33 = vpack.c.bf16 %v102_v32, %v100_v31 }
 0x11f   :  { %184 = vmatmul.bf16.vlgmr.msra.gmra.mxu2 %v106_v33 }
 0x18c   :  { %v180_v34 = vpop.f32.mrf.mxu1 }
 0x18d   :  { %v304_v40 = vrot.slane %v180_v34, 4  ;;  %v261_v41 = vrot.slane %v180_v34, 3  ;;  %v195_v42 = vrot.slane %v180_v34, 1  ;;  %v218_v47 = vrot.slane %v180_v34, 2 }
 0x194   :  { %v182_v35 = vpop.f32.mrf.mxu1 }
 0x195   :  { %v262_v36 = vrot.slane %v182_v35, 3  ;;  %v219_v37 = vrot.slane %v182_v35, 2  ;;  %v196_v38 = vrot.slane %v182_v35, 1  ;;  %v305_v39 = vrot.slane %v182_v35, 4 }
 0x197   :  { %269 = vrot.lane.b32.xlu1 %v262_v36, %s523_s0  ;;  %226 = vrot.lane.b32.xlu0 %v219_v37, %s524_s1  ;;  %v306_v43 = vsel %vm303_vm5, %v304_v40, %v305_v39  ;;  %v263_v44 = vsel %vm260_vm6, %v261_v41, %v262_v36  ;;  %v197_v45 = vsel %vm194_vm7, %v195_v42, %v196_v38 }
 0x198   :  { %203 = vrot.lane.b32.xlu2 %v196_v38, %s525_s7  ;;  %v220_v48 = vsel %vm217_vm8, %v218_v47, %v219_v37 }
 0x19f   :  { %310 = vrot.lane.b32.xlu1 %v306_v43, %s526_s8  ;;  %267 = vrot.lane.b32.xlu0 %v263_v44, %s523_s0 }
 0x1a0   :  { %201 = vrot.lane.b32.xlu2 %v197_v45, %s525_s7 }
 0x1a2   :  { %v584_v46 = vpop.f32.mrf.mxu2 }
 0x1a3   :  { %v221_v53 = vrot.slane %v584_v46, 2  ;;  %v198_v54 = vrot.slane %v584_v46, 1  ;;  %v264_v57 = vrot.slane %v584_v46, 3  ;;  %v307_v60 = vrot.slane %v584_v46, 4 }
 0x1a8   :  { %224 = vrot.lane.b32.xlu2 %v220_v48, %s524_s1 }
 0x1aa   :  { %v187_v49 = vpop.f32.mrf.mxu2 }
 0x1ab   :  { %v265_v50 = vrot.slane %v187_v49, 3  ;;  %v199_v51 = vrot.slane %v187_v49, 1  ;;  %v222_v52 = vrot.slane %v187_v49, 2  ;;  %v308_v59 = vrot.slane %v187_v49, 4 }
 0x1ad   :  { %273 = vrot.lane.b32.xlu0 %v265_v50, %s523_s0  ;;  %207 = vrot.lane.b32.xlu1 %v199_v51, %s525_s7  ;;  %v223_v55 = vsel %vm217_vm8, %v221_v53, %v222_v52  ;;  %v200_v56 = vsel %vm194_vm7, %v198_v54, %v199_v51  ;;  %v266_v58 = vsel %vm260_vm6, %v264_v57, %v265_v50 }
 0x1ae   :  { %v309_v61 = vsel %vm303_vm5, %v307_v60, %v308_v59 }
 0x1b0   :  { %230 = vrot.lane.b32.xlu2 %v222_v52, %s524_s1 }
 0x1b5   :  { %228 = vrot.lane.b32.xlu1 %v223_v55, %s524_s1  ;;  %205 = vrot.lane.b32.xlu0 %v200_v56, %s525_s7 }
 0x1b8   :  { %271 = vrot.lane.b32.xlu2 %v266_v58, %s523_s0 }
 0x1bd   :  { %316 = vrot.lane.b32.xlu1 %v308_v59, %s526_s8  ;;  %314 = vrot.lane.b32.xlu0 %v309_v61, %s526_s8 }
 0x1c0   :  { %312 = vrot.lane.b32.xlu2 %v305_v39, %s526_s8 }
 0x1f2   :  { %v204_v62 = vpop.permute.xlu2 %203 }
 0x1f3   :  { %v214_v2 = vadd.f32 %v204_v62, %v182_v35 }
 0x1fa   :  { %v202_v63 = vpop.permute.xlu2 %201 }
 0x1fb   :  { %v213_v1 = vadd.f32 %v202_v63, %v180_v34 }
 0x202   :  { %v225_v0 = vpop.permute.xlu2 %224 }
 0x203   :  { %v236_v3 = vadd.f32 %v225_v0, %v213_v1 }
 0x205   :  { %v241_v7 = vsel %vm240_vm9, %v236_v3, -inf }
 0x209   :  { %v227_v4 = vpop.permute.xlu0 %226  ;;  %v270_v9 = vpop.permute.xlu1 %269 }
 0x20a   :  { %v237_v5 = vadd.f32 %v227_v4, %v214_v2  ;;  %v231_v6 = vpop.permute.xlu2 %230 }
 0x20c   :  { %v243_v8 = vsel %vm242_vm10, %v237_v5, -inf  ;;  %v280_v15 = vadd.f32 %v270_v9, %v237_v5 }
 0x20d   :  { %v244_v10 = vmax.f32 %v241_v7, %v243_v8 }
 0x20e   :  { %v286_v21 = vsel %vm285_vm12, %v280_v15, -inf }
 0x20f   :  { %v245_v26 = vrot.slane %v244_v10, 4 }
 0x211   :  { %v311_v12 = vpop.permute.xlu1 %310  ;;  %v268_v13 = vpop.permute.xlu0 %267  ;;  %v246_v34 = vmax.f32 %v244_v10, %v245_v26 }
 0x212   :  { %v272_v11 = vpop.permute.xlu2 %271  ;;  %v279_v14 = vadd.f32 %v268_v13, %v236_v3 }
 0x213   :  { %v247_v42 = vrot.slane %v246_v34, 2 }
 0x214   :  { %v284_v17 = vsel %vm283_vm11, %v279_v14, -inf  ;;  %v322_v22 = vadd.f32 %v311_v12, %v279_v14 }
 0x215   :  { %v287_v23 = vmax.f32 %v284_v17, %v286_v21  ;;  %v248_v54 = vmax.f32 %v246_v34, %v247_v42 }
 0x216   :  { %v327_v28 = vsel %vm326_vm14, %v322_v22, -inf }
 0x217   :  { %v288_v27 = vrot.slane %v287_v23, 4  ;;  %v249_v0 = vrot.slane %v248_v54, 1 }
 0x219   :  { %v289_v35 = vmax.f32 %v287_v23, %v288_v27 }
 0x21a   :  { %v313_v16 = vpop.permute.xlu2 %312 }
 0x21b   :  { %v323_v20 = vadd.f32 %v313_v16, %v280_v15  ;;  %v290_v44 = vrot.slane %v289_v35, 2 }
 0x21d   :  { %v329_v25 = vsel %vm328_vm13, %v323_v20, -inf  ;;  %v291_v59 = vmax.f32 %v289_v35, %v290_v44 }
 0x21e   :  { %v330_v30 = vmax.f32 %v327_v28, %v329_v25 }
 0x21f   :  { %v274_v18 = vpop.permute.xlu0 %273  ;;  %v208_v19 = vpop.permute.xlu1 %207  ;;  %v292_v4 = vrot.slane %v291_v59, 1 }
 0x220   :  { %v216_v24 = vadd.f32 %v208_v19, %v187_v49  ;;  %v331_v38 = vrot.slane %v330_v30, 4 }
 0x221   :  { %v293_v13 = vmax.f32 %v291_v59, %v292_v4 }
 0x222   :  { %v239_v29 = vadd.f32 %v231_v6, %v216_v24  ;;  %v332_v48 = vmax.f32 %v330_v30, %v331_v38  ;;  %v465_v24 = vld [vmem:[%s627_s3] ss:$0 sm:$0xff] }
 0x224   :  { %v282_v37 = vadd.f32 %v274_v18, %v239_v29  ;;  %v252_v39 = vsel %vm242_vm10, %v239_v29, -inf  ;;  %v333_v60 = vrot.slane %v332_v48, 2 }
 0x226   :  { %v295_v45 = vsel %vm285_vm12, %v282_v37, -inf  ;;  %v334_v5 = vmax.f32 %v332_v48, %v333_v60 }
 0x227   :  { %v229_v31 = vpop.permute.xlu1 %228  ;;  %v206_v32 = vpop.permute.xlu0 %205 }
 0x228   :  { %v215_v33 = vadd.f32 %v206_v32, %v584_v46  ;;  %v335_v16 = vrot.slane %v334_v5, 1 }
 0x22a   :  { %v238_v36 = vadd.f32 %v229_v31, %v215_v33  ;;  %v336_v20 = vmax.f32 %v334_v5, %v335_v16 }
 0x22c   :  { %v251_v40 = vsel %vm240_vm9, %v238_v36, -inf  ;;  %v281_v41 = vadd.f32 %v272_v11, %v238_v36  ;;  %v250_v11 = vmax.f32 %v248_v54, %v249_v0 }
 0x22d   :  { %v253_v43 = vmax.f32 %v251_v40, %v252_v39 }
 0x22e   :  { %v294_v47 = vsel %vm283_vm11, %v281_v41, -inf }
 0x22f   :  { %v254_v49 = vrot.slane %v253_v43, 4  ;;  %v317_v46 = vpop.permute.xlu1 %316  ;;  %v296_v50 = vmax.f32 %v294_v47, %v295_v45  ;;  %v315_v51 = vpop.permute.xlu0 %314 }
 0x230   :  { %v325_v52 = vadd.f32 %v317_v46, %v282_v37  ;;  %v324_v53 = vadd.f32 %v315_v51, %v281_v41 }
 0x231   :  { %v255_v55 = vmax.f32 %v253_v43, %v254_v49  ;;  %v297_v56 = vrot.slane %v296_v50, 4 }
 0x232   :  { %v338_v57 = vsel %vm328_vm13, %v325_v52, -inf  ;;  %v337_v58 = vsel %vm326_vm14, %v324_v53, -inf }
 0x233   :  { %v256_v61 = vrot.slane %v255_v55, 2  ;;  %v298_v62 = vmax.f32 %v296_v50, %v297_v56  ;;  %v339_v63 = vmax.f32 %v337_v58, %v338_v57 }
 0x235   :  { %v257_v1 = vmax.f32 %v255_v55, %v256_v61  ;;  %v299_v2 = vrot.slane %v298_v62, 2  ;;  %v340_v3 = vrot.slane %v339_v63, 4 }
 0x237   :  { %v341_v6 = vmax.f32 %v339_v63, %v340_v3  ;;  %v300_v7 = vmax.f32 %v298_v62, %v299_v2  ;;  %v258_v8 = vrot.slane %v257_v1, 1 }
 0x239   :  { %v342_v9 = vrot.slane %v341_v6, 2  ;;  %v301_v10 = vrot.slane %v300_v7, 1  ;;  %v259_v12 = vmax.f32 %v257_v1, %v258_v8 }
 0x23b   :  { %v343_v14 = vmax.f32 %v341_v6, %v342_v9  ;;  %v302_v15 = vmax.f32 %v300_v7, %v301_v10  ;;  %v349_v17 = vsel %vm348_vm15, %v259_v12, %v250_v11 }
 0x23d   :  { %v353_v18 = vsel %vm348_vm15, %v302_v15, %v293_v13  ;;  %v344_v19 = vrot.slane %v343_v14, 1 }
 0x23e   :  { %354 = vrot.lane.b32.xlu2 %v353_v18, %s524_s1 }
 0x23f   :  { %v345_v21 = vmax.f32 %v343_v14, %v344_v19 }
 0x241   :  { %v359_v22 = vsel %vm348_vm15, %v345_v21, %v336_v20 }
 0x242   :  { %360 = vrot.lane.b32.xlu0 %v359_v22, %s527_s9 }
 0x298   :  { %v355_v23 = vpop.permute.xlu2 %354 }
 0x299   :  { %v363_v25 = vsel %vm240_vm9, %v349_v17, %v355_v23 }
 0x2b4   :  { %v361_v26 = vpop.permute.xlu0 %360 }
 0x2b5   :  { %v365_v27 = vsel %vm364_vm0, %v363_v25, %v361_v26 }
 0x2b6   :  { %v367_v28 = vsel %vm366_vm1, %v365_v27, 0.0 }
 0x2b7   :  { %v372_v29 = vadd.f32 %v465_v24, %v367_v28 }
 0x2b9   :  { %v373_v30 = vmax.f32 %v372_v29, 0.0 }
 0x2bb   :  { %374 = vst [vmem:[#allocation5] sm:$0x3] %v373_v30 }
 0x2bc   :  { %385 = dma.vmem_to_hbm [thread:$0]  %s381_s13, 32, %s383_s16, [#allocation4]  }
 0x2bd   :  { %516 = dma.done.wait [#allocation4], 32  }
 0x2be   :  { %517 = vsyncadd [#allocation4], 4294967264 }
 0x2bf   :  { %390 = vsyncpa [#allocation3], 1 }
 0x2c0   :  { %391 = vsyncpa [#allocation4], 1 }

</bundles_post_ra>
